<compile_context>
chip_gen: v7x
topology: tpu7x:2x2x1
jax: 0.10.0
libtpu: 0.0.40
codegen_flags: <defaults>
</compile_context>

<pallas_src>
import numpy as np
import jax
import jax.numpy as jnp
from jax.experimental import pallas as pl
from jax.experimental.pallas import tpu as pltpu


_LANE = 128
_SUBLANE = 8
_MAX_TILE_ROWS = 1024          # per-step FM tile rows (bf16 => 256 KiB/buffer)
_LOG_EPS = float(np.log(1e-5))


# ------------------------------ Pallas kernel ------------------------------

def _make_fused_kernel(mel_inv_count):
    """Fused FM-L1 + GAN-MSE + mel-L1 kernel, gridded over FM row tiles."""

    def kernel(fm_hat_ref, fm_gt_ref, gan_ref,
               frames_ref, basis_ref, melfb_ref, mel_tgt_ref,
               o_ref, acc_ref):
        step = pl.program_id(0)

        # ---- step 0: zero accumulator + once-only GAN / mel work ----------
        @pl.when(step == 0)
        def _():
            acc_ref[...] = jnp.zeros_like(acc_ref)

            # GAN: inputs pre-packed as (x - 1) * sqrt(1/n), padding = 0,
            # so sum of squares == sum_i mean (x_i - 1)^2.
            g = gan_ref[...].astype(jnp.float32)
            acc_ref[1:2, :] = jnp.sum(g * g, axis=0, keepdims=True)

            # Mel: Hann-windowed DFT as bf16 matmul (f32 accumulate), power,
            # duplicated mel filterbank (bf16 x bf16 -> f32), log, L1 lanes.
            both = jnp.dot(frames_ref[...], basis_ref[...],
                           preferred_element_type=jnp.float32)
            power = (both * both).astype(jnp.bfloat16)
            mel = jnp.dot(power, melfb_ref[...],
                          preferred_element_type=jnp.float32)
            logmel = jnp.log(jnp.maximum(mel, 1e-5))
            acc_ref[2:3, :] = jnp.sum(jnp.abs(logmel - mel_tgt_ref[...]),
                                      axis=0, keepdims=True)

        # ---- every step: FM tile accumulate (inputs pre-scaled by 1/n_i) --
        h = fm_hat_ref[...].astype(jnp.float32)      # cast once per tile
        t = fm_gt_ref[...].astype(jnp.float32)
        acc_ref[0:1, :] += jnp.sum(jnp.abs(h - t), axis=0, keepdims=True)

        # ---- last step: cross-lane reduce + one lane-dense (1,128) store --
        @pl.when(step == pl.num_programs(0) - 1)
        def _():
            fm_sum = jnp.sum(acc_ref[0:1, :])
            gan_sum = jnp.sum(acc_ref[1:2, :])
            mel_sum = jnp.sum(acc_ref[2:3, :]) * mel_inv_count
            lane = jax.lax.broadcasted_iota(jnp.int32, (1, _LANE), 1)
            out = jnp.where(lane == 0, fm_sum, 0.0)
            out = jnp.where(lane == 1, gan_sum, out)
            out = jnp.where(lane == 2, mel_sum, out)
            o_ref[...] = out

    return kernel


# ------------------------------ packing glue -------------------------------

def _ceil_to(x, m):
    return -(-x // m) * m


def _pack_fm_pairs(hats, gts):
    """Flatten each (hat, gt) pair lane-dense, fold 1/n into the data (bf16)."""
    hat_rows, gt_rows = [], []
    for h, g in zip(hats, gts):
        h = jnp.asarray(h, jnp.float32).reshape(-1)
        g = jnp.asarray(g, jnp.float32).reshape(-1)
        n = int(h.shape[0])
        w = 1.0 / n                               # mean => sum of w*|h-g|
        r = _ceil_to(n, _LANE) // _LANE
        pad = r * _LANE - n
        hat_rows.append(jnp.pad(h * w, (0, pad)).reshape(r, _LANE))
        gt_rows.append(jnp.pad(g * w, (0, pad)).reshape(r, _LANE))
    hat = jnp.concatenate(hat_rows, axis=0).astype(jnp.bfloat16)
    gt = jnp.concatenate(gt_rows, axis=0).astype(jnp.bfloat16)
    return hat, gt


def _pack_mse_to_one(xs):
    """Pack (x-1)*sqrt(1/n) lane-dense (pad 0, bf16); kernel just sums squares."""
    rows = []
    for x in xs:
        x = jnp.asarray(x, jnp.float32).reshape(-1)
        n = int(x.shape[0])
        s = float(np.sqrt(1.0 / n))
        r = _ceil_to(n, _LANE) // _LANE
        pad = r * _LANE - n
        rows.append(jnp.pad((x - 1.0) * s, (0, pad)).reshape(r, _LANE))
    g = jnp.concatenate(rows, axis=0)
    rp = _ceil_to(g.shape[0], _SUBLANE) - g.shape[0]
    if rp:
        g = jnp.pad(g, ((0, rp), (0, 0)))
    return g.astype(jnp.bfloat16)


def _frame_audio_slices(audio, n_fft, hop):
    """[B, T] -> [B*n_frames, n_fft] via static slices only (no gather)."""
    B, T = audio.shape
    n_frames = (T - n_fft) // hop + 1
    steps = n_fft // hop
    n_chunks = T // hop
    chunks = audio[:, : n_chunks * hop].reshape(B, n_chunks, hop)
    parts = [chunks[:, i:i + n_frames, :] for i in range(steps)]
    frames = jnp.stack(parts, axis=2).reshape(B, n_frames, steps * hop)
    return frames.reshape(B * n_frames, n_fft), n_frames


def _mel_filterbank_np(n_mels, n_fft, sample_rate):
    """Deterministic HTK-style triangular mel filterbank [n_freq, n_mels]."""
    n_freq = n_fft // 2 + 1

    def hz_to_mel(f):
        return 2595.0 * np.log10(1.0 + f / 700.0)

    def mel_to_hz(m):
        return 700.0 * (10.0 ** (m / 2595.0) - 1.0)

    mels = np.linspace(hz_to_mel(0.0), hz_to_mel(sample_rate / 2.0), n_mels + 2)
    hz = mel_to_hz(mels)
    bins = np.floor((n_fft + 1) * hz / sample_rate).astype(int)
    fb = np.zeros((n_freq, n_mels), np.float32)
    for m in range(1, n_mels + 1):
        l, c, r = bins[m - 1], bins[m], bins[m + 1]
        for k in range(l, c):
            if c > l:
                fb[k, m - 1] = (k - l) / (c - l)
        for k in range(c, r):
            if r > c:
                fb[k, m - 1] = (r - k) / (r - c)
    return fb


def _build_mel_bases(n_fft, n_mels, sample_rate):
    """Hann-windowed [cos|sin] DFT basis + duplicated mel filterbank (bf16)."""
    n_freq = n_fft // 2 + 1
    n = np.arange(n_fft)
    k = np.arange(n_freq)
    ang = 2.0 * np.pi * np.outer(n, k) / n_fft
    window = 0.5 - 0.5 * np.cos(2.0 * np.pi * n / n_fft)
    cos_b = window[:, None] * np.cos(ang)
    sin_b = -window[:, None] * np.sin(ang)

    n_fft_pad = _ceil_to(n_fft, _LANE)
    basis_cols = _ceil_to(2 * n_freq, _LANE)
    basis = np.zeros((n_fft_pad, basis_cols), np.float32)
    basis[:n_fft, :n_freq] = cos_b
    basis[:n_fft, n_freq:2 * n_freq] = sin_b

    fb = _mel_filterbank_np(n_mels, n_fft, sample_rate)
    mel_cols = _ceil_to(n_mels, _LANE)
    melfb2 = np.zeros((basis_cols, mel_cols), np.float32)
    melfb2[:n_freq, :n_mels] = fb
    melfb2[n_freq:2 * n_freq, :n_mels] = fb

    return (jnp.asarray(basis, jnp.bfloat16),
            jnp.asarray(melfb2, jnp.bfloat16),
            n_fft_pad, mel_cols)


# ------------------------------- loss module -------------------------------

class HiFiGANLossG:
    """JAX/Pallas port of HiFiGANLoss_G (forward only, single fused kernel)."""

    def __init__(self, fm=0.0, gan=0.0, mel=0.0,
                 n_fft=64, hop=16, n_mels=16, sample_rate=8000):
        assert n_fft % hop == 0, "synthetic mel front-end assumes hop | n_fft"
        self.fm = float(fm)
        self.gan = float(gan)
        self.mel = float(mel)
        self.n_fft = n_fft
        self.hop = hop
        self.n_mels = n_mels
        self.sample_rate = sample_rate
        (self.basis_bf16, self.melfb2,
         self.n_fft_pad, self.mel_cols) = _build_mel_bases(
            n_fft, n_mels, sample_rate)
        self._forward_jit = jax.jit(self._forward)

    # ------------------------------------------------------------------ mel
    def _pack_mel(self, audio_hat, spectrogram):
        audio = jnp.asarray(audio_hat, jnp.float32)
        if audio.ndim == 3:                      # [B, 1, T] -> [B, T]
            audio = audio.reshape(audio.shape[0], audio.shape[-1])
        frames, _ = _frame_audio_slices(audio, self.n_fft, self.hop)
        N = frames.shape[0]
        Np = _ceil_to(N, _SUBLANE)
        frames = jnp.pad(frames, ((0, Np - N),
                                  (0, self.n_fft_pad - self.n_fft)))
        frames = frames.astype(jnp.bfloat16)
        # spectrogram [B, n_mels, n_frames] -> frames-major [N, n_mels]
        tgt = jnp.transpose(jnp.asarray(spectrogram, jnp.float32), (0, 2, 1))
        tgt = tgt.reshape(N, self.n_mels)
        tgt = jnp.pad(tgt, ((0, Np - N), (0, self.mel_cols - self.n_mels)),
                      constant_values=_LOG_EPS)   # pad rows/cols contribute 0
        return frames, tgt, N * self.n_mels

    # -------------------------------------------------------------- forward
    def _forward(self, dfeats_hat, dfeats, discrim_hat_p, audio_hat,
                 spectrogram):
        fm_hat, fm_gt = _pack_fm_pairs(dfeats_hat, dfeats)
        gan_x = _pack_mse_to_one(discrim_hat_p)
        frames, mel_tgt, mel_count = self._pack_mel(audio_hat, spectrogram)

        # Row-tile the FM buffers (dominant, HBM-bound path).
        rows = int(fm_hat.shape[0])
        tile_r = min(_MAX_TILE_ROWS, _ceil_to(rows, _SUBLANE))
        rows_p = _ceil_to(rows, tile_r)
        if rows_p != rows:
            fm_hat = jnp.pad(fm_hat, ((0, rows_p - rows), (0, 0)))
            fm_gt = jnp.pad(fm_gt, ((0, rows_p - rows), (0, 0)))
        n_tiles = rows_p // tile_r

        # VMEM budget: 2 double-buffered bf16 FM tiles + resident blocks.
        resident = (gan_x.size * 2 + frames.size * 2
                    + self.basis_bf16.size * 2 + self.melfb2.size * 2
                    + mel_tgt.size * 4 + (_SUBLANE + 1) * _LANE * 4)
        need = 2 * 2 * tile_r * _LANE * 2 + resident
        vmem_limit = int(min(48 * 1024 * 1024,
                             max(8 * 1024 * 1024, 2 * need)))

        kernel = _make_fused_kernel(1.0 / float(mel_count))
        grid_spec = pltpu.PrefetchScalarGridSpec(
            num_scalar_prefetch=0,
            grid=(n_tiles,),
            in_specs=[
                pl.BlockSpec((tile_r, _LANE), lambda i: (i, 0)),     # fm_hat
                pl.BlockSpec((tile_r, _LANE), lambda i: (i, 0)),     # fm_gt
                pl.BlockSpec(gan_x.shape, lambda i: (0, 0)),         # gan
                pl.BlockSpec(frames.shape, lambda i: (0, 0)),        # frames
                pl.BlockSpec(self.basis_bf16.shape, lambda i: (0, 0)),
                pl.BlockSpec(self.melfb2.shape, lambda i: (0, 0)),
                pl.BlockSpec(mel_tgt.shape, lambda i: (0, 0)),
            ],
            out_specs=pl.BlockSpec((1, _LANE), lambda i: (0, 0)),
            scratch_shapes=[pltpu.VMEM((_SUBLANE, _LANE), jnp.float32)],
        )
        out = pl.pallas_call(
            kernel,
            out_shape=jax.ShapeDtypeStruct((1, _LANE), jnp.float32),
            grid_spec=grid_spec,
            compiler_params=pltpu.CompilerParams(
                dimension_semantics=("arbitrary",),
                vmem_limit_bytes=vmem_limit),
        )(fm_hat, fm_gt, gan_x, frames, self.basis_bf16, self.melfb2, mel_tgt)

        fm_loss = out[0, 0]
        gan_loss = out[0, 1]
        mel_loss = out[0, 2]
        total = fm_loss * self.fm + gan_loss * self.gan + mel_loss * self.mel
        return {"fm_loss": fm_loss, "gan_loss_g": gan_loss,
                "mel_loss": mel_loss, "g_loss": total}

    def __call__(self, *, dfeats_hat=None, dfeats=None, discrim_hat_p=None,
                 audio_hat=None, spectrogram=None, **kwargs):
        # Disabled / missing components get neutral dummies whose loss is
        # exactly 0.0 (f32), matching torch's `tensor(0)` fallbacks.
        if self.fm == 0 or dfeats_hat is None or dfeats is None:
            dfeats_hat = [jnp.zeros((_LANE,), jnp.float32)]
            dfeats = [jnp.zeros((_LANE,), jnp.float32)]
        if self.gan == 0 or discrim_hat_p is None:
            discrim_hat_p = [jnp.ones((_LANE,), jnp.float32)]
        if self.mel == 0 or audio_hat is None or spectrogram is None:
            audio_hat = jnp.zeros((1, self.n_fft), jnp.float32)
            spectrogram = jnp.full((1, self.n_mels, 1), _LOG_EPS, jnp.float32)
        return self._forward_jit(dfeats_hat, dfeats, discrim_hat_p,
                                 audio_hat, spectrogram)


# ---------------------------------- main -----------------------------------

if __name__ == "__main__":
    key = jax.random.PRNGKey(0)
    keys = jax.random.split(key, 10)

    B = 2
    T = 256
    loss_mod = HiFiGANLossG(fm=2.0, gan=1.0, mel=45.0)

    # discriminator feature maps (hat / ground truth), varying shapes
    dfeats = [
        jax.random.normal(keys[0], (B, 4, 32), jnp.float32),
        jax.random.normal(keys[1], (B, 8, 16), jnp.float32),
        jax.random.normal(keys[2], (B, 16, 8), jnp.float32),
    ]
    dfeats_hat = [
        jax.random.normal(keys[3], (B, 4, 32), jnp.float32),
        jax.random.normal(keys[4], (B, 8, 16), jnp.float32),
        jax.random.normal(keys[5], (B, 16, 8), jnp.float32),
    ]
    # discriminator outputs on generated audio
    discrim_hat_p = [
        jax.random.normal(keys[6], (B, 1, 32), jnp.float32),
        jax.random.normal(keys[7], (B, 1, 16), jnp.float32),
    ]
    # generated audio and target mel spectrogram
    audio_hat = 0.1 * jax.random.normal(keys[8], (B, T), jnp.float32)
    n_frames = (T - loss_mod.n_fft) // loss_mod.hop + 1
    spectrogram = jax.random.normal(
        keys[9], (B, loss_mod.n_mels, n_frames), jnp.float32)

    out = loss_mod(
        dfeats_hat=dfeats_hat,
        dfeats=dfeats,
        discrim_hat_p=discrim_hat_p,
        audio_hat=audio_hat,
        spectrogram=spectrogram,
    )
    jax.block_until_ready(out["g_loss"])
    assert all(bool(jnp.isfinite(out[k])) for k in ("fm_loss", "gan_loss_g",
                                                    "mel_loss", "g_loss"))
    print("KERNEL_OK")
</pallas_src>

<mosaic_0001>
module attributes {stable_mosaic.version = 11 : i64} {
  func.func @kernel(%arg0: i32, %arg1: memref<8x128xbf16, #tpu.memory_space<vmem>>, %arg2: memref<8x128xbf16, #tpu.memory_space<vmem>>, %arg3: memref<8x128xbf16, #tpu.memory_space<vmem>>, %arg4: memref<32x128xbf16, #tpu.memory_space<vmem>>, %arg5: memref<128x128xbf16, #tpu.memory_space<vmem>>, %arg6: memref<128x128xbf16, #tpu.memory_space<vmem>>, %arg7: memref<32x128xf32, #tpu.memory_space<vmem>>, %arg8: memref<1x128xf32, #tpu.memory_space<vmem>>, %arg9: memref<8x128xf32, #tpu.memory_space<vmem>>) attributes {dimension_semantics = [#tpu.dimension_semantics<arbitrary>], iteration_bounds = array<i64: 1>, scalar_prefetch = 0 : i64, scratch_operands = 1 : i64, tpu.core_type = #tpu.core_type<tc>, window_params = [{transform_indices = @transform_0, window_bounds = array<i64: 8, 128>}, {transform_indices = @transform_1, window_bounds = array<i64: 8, 128>}, {pipeline_mode = #tpu.pipeline_mode<synchronous>, transform_indices = @transform_2, window_bounds = array<i64: 8, 128>}, {pipeline_mode = #tpu.pipeline_mode<synchronous>, transform_indices = @transform_3, window_bounds = array<i64: 32, 128>}, {pipeline_mode = #tpu.pipeline_mode<synchronous>, transform_indices = @transform_4, window_bounds = array<i64: 128, 128>}, {pipeline_mode = #tpu.pipeline_mode<synchronous>, transform_indices = @transform_5, window_bounds = array<i64: 128, 128>}, {pipeline_mode = #tpu.pipeline_mode<synchronous>, transform_indices = @transform_6, window_bounds = array<i64: 32, 128>}, {pipeline_mode = #tpu.pipeline_mode<synchronous>, transform_indices = @transform_7, window_bounds = array<i64: 1, 128>}]} {
    %c0_i32 = arith.constant 0 : i32
    %0 = arith.cmpi eq, %arg0, %c0_i32 : i32
    %1 = arith.extui %0 : i1 to i32
    %c0_i32_0 = arith.constant 0 : i32
    %2 = arith.cmpi ne, %1, %c0_i32_0 : i32
    scf.if %2 {
      %cst_10 = arith.constant 0.000000e+00 : f32
      %17 = vector.broadcast %cst_10 : f32 to vector<8x128xf32>
      %c0_11 = arith.constant 0 : index
      %c0_12 = arith.constant 0 : index
      %18 = vector.load %arg9[%c0_11, %c0_12] : memref<8x128xf32, #tpu.memory_space<vmem>>, vector<8x128xf32>
      tpu.vector_store %arg9[%c0_11, %c0_12], %17 {strides = array<i32>} : memref<8x128xf32, #tpu.memory_space<vmem>>, vector<8x128xf32>,
      %c0_13 = arith.constant 0 : index
      %c0_14 = arith.constant 0 : index
      %19 = vector.load %arg3[%c0_13, %c0_14] : memref<8x128xbf16, #tpu.memory_space<vmem>>, vector<8x128xbf16>
      %20 = arith.extf %19 : vector<8x128xbf16> to vector<8x128xf32>
      %21 = arith.mulf %20, %20 : vector<8x128xf32>
      %cst_15 = arith.constant dense<0.000000e+00> : vector<128xf32>
      %22 = vector.multi_reduction <add>, %21, %cst_15 [0] : vector<8x128xf32> to vector<128xf32>
      %23 = vector.shape_cast %22 : vector<128xf32> to vector<1x128xf32>
      %c1 = arith.constant 1 : index
      %c0_16 = arith.constant 0 : index
      %24 = vector.load %arg9[%c1, %c0_16] : memref<8x128xf32, #tpu.memory_space<vmem>>, vector<1x128xf32>
      tpu.vector_store %arg9[%c1, %c0_16], %23 {strides = array<i32>} : memref<8x128xf32, #tpu.memory_space<vmem>>, vector<1x128xf32>,
      %c0_17 = arith.constant 0 : index
      %c0_18 = arith.constant 0 : index
      %25 = vector.load %arg4[%c0_17, %c0_18] : memref<32x128xbf16, #tpu.memory_space<vmem>>, vector<32x128xbf16>
      %c0_19 = arith.constant 0 : index
      %c0_20 = arith.constant 0 : index
      %26 = vector.load %arg5[%c0_19, %c0_20] : memref<128x128xbf16, #tpu.memory_space<vmem>>, vector<128x128xbf16>
      %cst_21 = arith.constant dense<0.000000e+00> : vector<32x128xf32>
      %27 = tpu.matmul %25, %26, %cst_21 {dimension_numbers = #tpu.dot_dimension_numbers<[1], [0], [0], [1], [0, 0, 1, 1], [], []>} : vector<32x128xbf16>, vector<128x128xbf16>, vector<32x128xf32> -> vector<32x128xf32>
      %28 = arith.mulf %27, %27 : vector<32x128xf32>
      %29 = arith.truncf %28 : vector<32x128xf32> to vector<32x128xbf16>
      %c0_22 = arith.constant 0 : index
      %c0_23 = arith.constant 0 : index
      %30 = vector.load %arg6[%c0_22, %c0_23] : memref<128x128xbf16, #tpu.memory_space<vmem>>, vector<128x128xbf16>
      %cst_24 = arith.constant dense<0.000000e+00> : vector<32x128xf32>
      %31 = tpu.matmul %29, %30, %cst_24 {dimension_numbers = #tpu.dot_dimension_numbers<[1], [0], [0], [1], [0, 0, 1, 1], [], []>} : vector<32x128xbf16>, vector<128x128xbf16>, vector<32x128xf32> -> vector<32x128xf32>
      %cst_25 = arith.constant 9.99999974E-6 : f32
      %32 = vector.broadcast %cst_25 : f32 to vector<32x128xf32>
      %33 = arith.maximumf %31, %32 : vector<32x128xf32>
      %34 = math.log %33 : vector<32x128xf32>
      %c0_26 = arith.constant 0 : index
      %c0_27 = arith.constant 0 : index
      %35 = vector.load %arg7[%c0_26, %c0_27] : memref<32x128xf32, #tpu.memory_space<vmem>>, vector<32x128xf32>
      %36 = arith.subf %34, %35 : vector<32x128xf32>
      %37 = math.absf %36 : vector<32x128xf32>
      %cst_28 = arith.constant dense<0.000000e+00> : vector<128xf32>
      %38 = vector.multi_reduction <add>, %37, %cst_28 [0] : vector<32x128xf32> to vector<128xf32>
      %39 = vector.shape_cast %38 : vector<128xf32> to vector<1x128xf32>
      %c2 = arith.constant 2 : index
      %c0_29 = arith.constant 0 : index
      %40 = vector.load %arg9[%c2, %c0_29] : memref<8x128xf32, #tpu.memory_space<vmem>>, vector<1x128xf32>
      tpu.vector_store %arg9[%c2, %c0_29], %39 {strides = array<i32>} : memref<8x128xf32, #tpu.memory_space<vmem>>, vector<1x128xf32>,
    } else {
    }
    %c0 = arith.constant 0 : index
    %c0_1 = arith.constant 0 : index
    %3 = vector.load %arg1[%c0, %c0_1] : memref<8x128xbf16, #tpu.memory_space<vmem>>, vector<8x128xbf16>
    %4 = arith.extf %3 : vector<8x128xbf16> to vector<8x128xf32>
    %c0_2 = arith.constant 0 : index
    %c0_3 = arith.constant 0 : index
    %5 = vector.load %arg2[%c0_2, %c0_3] : memref<8x128xbf16, #tpu.memory_space<vmem>>, vector<8x128xbf16>
    %6 = arith.extf %5 : vector<8x128xbf16> to vector<8x128xf32>
    %c0_4 = arith.constant 0 : index
    %c0_5 = arith.constant 0 : index
    %7 = vector.load %arg9[%c0_4, %c0_5] : memref<8x128xf32, #tpu.memory_space<vmem>>, vector<1x128xf32>
    %8 = arith.subf %4, %6 : vector<8x128xf32>
    %9 = math.absf %8 : vector<8x128xf32>
    %cst = arith.constant dense<0.000000e+00> : vector<128xf32>
    %10 = vector.multi_reduction <add>, %9, %cst [0] : vector<8x128xf32> to vector<128xf32>
    %11 = vector.shape_cast %10 : vector<128xf32> to vector<1x128xf32>
    %12 = arith.addf %7, %11 : vector<1x128xf32>
    %c0_6 = arith.constant 0 : index
    %c0_7 = arith.constant 0 : index
    %13 = vector.load %arg9[%c0_6, %c0_7] : memref<8x128xf32, #tpu.memory_space<vmem>>, vector<1x128xf32>
    tpu.vector_store %arg9[%c0_6, %c0_7], %12 {strides = array<i32>} : memref<8x128xf32, #tpu.memory_space<vmem>>, vector<1x128xf32>,
    %c0_i32_8 = arith.constant 0 : i32
    %14 = arith.cmpi eq, %arg0, %c0_i32_8 : i32
    %15 = arith.extui %14 : i1 to i32
    %c0_i32_9 = arith.constant 0 : i32
    %16 = arith.cmpi ne, %15, %c0_i32_9 : i32
    scf.if %16 {
      %c0_10 = arith.constant 0 : index
      %c0_11 = arith.constant 0 : index
      %17 = vector.load %arg9[%c0_10, %c0_11] : memref<8x128xf32, #tpu.memory_space<vmem>>, vector<1x128xf32>
      %18 = vector.shape_cast %17 : vector<1x128xf32> to vector<1x1x128xf32>
      %cst_12 = arith.constant dense<0.000000e+00> : vector<1xf32>
      %19 = vector.multi_reduction <add>, %18, %cst_12 [1, 2] : vector<1x1x128xf32> to vector<1xf32>
      %20 = vector.shape_cast %19 : vector<1xf32> to vector<1x1x1xf32>
      %21 = vector.extract %20[0, 0, 0] : f32 from vector<1x1x1xf32>
      %c1 = arith.constant 1 : index
      %c0_13 = arith.constant 0 : index
      %22 = vector.load %arg9[%c1, %c0_13] : memref<8x128xf32, #tpu.memory_space<vmem>>, vector<1x128xf32>
      %23 = vector.shape_cast %22 : vector<1x128xf32> to vector<1x1x128xf32>
      %cst_14 = arith.constant dense<0.000000e+00> : vector<1xf32>
      %24 = vector.multi_reduction <add>, %23, %cst_14 [1, 2] : vector<1x1x128xf32> to vector<1xf32>
      %25 = vector.shape_cast %24 : vector<1xf32> to vector<1x1x1xf32>
      %26 = vector.extract %25[0, 0, 0] : f32 from vector<1x1x1xf32>
      %c2 = arith.constant 2 : index
      %c0_15 = arith.constant 0 : index
      %27 = vector.load %arg9[%c2, %c0_15] : memref<8x128xf32, #tpu.memory_space<vmem>>, vector<1x128xf32>
      %28 = vector.shape_cast %27 : vector<1x128xf32> to vector<1x1x128xf32>
      %cst_16 = arith.constant dense<0.000000e+00> : vector<1xf32>
      %29 = vector.multi_reduction <add>, %28, %cst_16 [1, 2] : vector<1x1x128xf32> to vector<1xf32>
      %30 = vector.shape_cast %29 : vector<1xf32> to vector<1x1x1xf32>
      %31 = vector.extract %30[0, 0, 0] : f32 from vector<1x1x1xf32>
      %cst_17 = arith.constant 0.00240384624 : f32
      %32 = arith.mulf %31, %cst_17 : f32
      %33 = tpu.iota {dimensions = array<i32: 1>} : vector<1x128xi32>
      %c0_i32_18 = arith.constant 0 : i32
      %34 = vector.broadcast %c0_i32_18 : i32 to vector<1x128xi32>
      %35 = arith.cmpi eq, %33, %34 : vector<1x128xi32>
      %cst_19 = arith.constant 0.000000e+00 : f32
      %36 = vector.broadcast %21 : f32 to vector<1x128xf32>
      %37 = vector.broadcast %cst_19 : f32 to vector<1x128xf32>
      %38 = arith.select %35, %36, %37 : vector<1x128xi1>, vector<1x128xf32>
      %c1_i32 = arith.constant 1 : i32
      %39 = vector.broadcast %c1_i32 : i32 to vector<1x128xi32>
      %40 = arith.cmpi eq, %33, %39 : vector<1x128xi32>
      %41 = vector.broadcast %26 : f32 to vector<1x128xf32>
      %42 = arith.select %40, %41, %38 : vector<1x128xi1>, vector<1x128xf32>
      %c2_i32 = arith.constant 2 : i32
      %43 = vector.broadcast %c2_i32 : i32 to vector<1x128xi32>
      %44 = arith.cmpi eq, %33, %43 : vector<1x128xi32>
      %45 = vector.broadcast %32 : f32 to vector<1x128xf32>
      %46 = arith.select %44, %45, %42 : vector<1x128xi1>, vector<1x128xf32>
      %c0_20 = arith.constant 0 : index
      %c0_21 = arith.constant 0 : index
      %47 = vector.load %arg8[%c0_20, %c0_21] : memref<1x128xf32, #tpu.memory_space<vmem>>, vector<1x128xf32>
      tpu.vector_store %arg8[%c0_20, %c0_21], %46 {strides = array<i32>} : memref<1x128xf32, #tpu.memory_space<vmem>>, vector<1x128xf32>,
    } else {
    }
    return
  }
  func.func @transform_0(%arg0: i32) -> (i32, i32) {
    %c0_i32 = arith.constant 0 : i32
    %c0_i32_0 = arith.constant 0 : i32
    return %arg0, %c0_i32 : i32, i32
  }
  func.func @transform_1(%arg0: i32) -> (i32, i32) {
    %c0_i32 = arith.constant 0 : i32
    %c0_i32_0 = arith.constant 0 : i32
    return %arg0, %c0_i32 : i32, i32
  }
  func.func @transform_2(%arg0: i32) -> (i32, i32) {
    %c0_i32 = arith.constant 0 : i32
    %c0_i32_0 = arith.constant 0 : i32
    %c0_i32_1 = arith.constant 0 : i32
    return %c0_i32, %c0_i32_0 : i32, i32
  }
  func.func @transform_3(%arg0: i32) -> (i32, i32) {
    %c0_i32 = arith.constant 0 : i32
    %c0_i32_0 = arith.constant 0 : i32
    %c0_i32_1 = arith.constant 0 : i32
    return %c0_i32, %c0_i32_0 : i32, i32
  }
  func.func @transform_4(%arg0: i32) -> (i32, i32) {
    %c0_i32 = arith.constant 0 : i32
    %c0_i32_0 = arith.constant 0 : i32
    %c0_i32_1 = arith.constant 0 : i32
    return %c0_i32, %c0_i32_0 : i32, i32
  }
  func.func @transform_5(%arg0: i32) -> (i32, i32) {
    %c0_i32 = arith.constant 0 : i32
    %c0_i32_0 = arith.constant 0 : i32
    %c0_i32_1 = arith.constant 0 : i32
    return %c0_i32, %c0_i32_0 : i32, i32
  }
  func.func @transform_6(%arg0: i32) -> (i32, i32) {
    %c0_i32 = arith.constant 0 : i32
    %c0_i32_0 = arith.constant 0 : i32
    %c0_i32_1 = arith.constant 0 : i32
    return %c0_i32, %c0_i32_0 : i32, i32
  }
  func.func @transform_7(%arg0: i32) -> (i32, i32) {
    %c0_i32 = arith.constant 0 : i32
    %c0_i32_0 = arith.constant 0 : i32
    %c0_i32_1 = arith.constant 0 : i32
    return %c0_i32, %c0_i32_0 : i32, i32
  }
}

</mosaic_0001>

<bundles_post_ra>
// kernel: _forward.1
= control target key start
LH: loop header
LB: loop body
LE: loop exit
PB: predicated region body
PF: predicated region fallthrough
CT: control target
= control target key end

     0   :  { %v504_v38 = vmov 0.0   ;;  %vm343_vm0 = vcmask 1040384   ;;  %s626_s4 = inlined_call_operand.vmem [shape: bf16[128,128], index: 4, kind: input, shape index: {}]   ;;  %s627_s3 = inlined_call_operand.vmem [shape: bf16[32,128], index: 3, kind: input, shape index: {}]   ;;  %s628_s5 = inlined_call_operand.vmem [shape: bf16[128,128], index: 5, kind: input, shape index: {}]   ;;  %s629_s0 = inlined_call_operand.vmem [shape: bf16[8,128], index: 0, kind: input, shape index: {}]   ;;  %s630_s1 = inlined_call_operand.vmem [shape: bf16[8,128], index: 1, kind: input, shape index: {}]   ;;  %s631_s2 = inlined_call_operand.vmem [shape: bf16[8,128], index: 2, kind: input, shape index: {}]   ;;  %s632_s6 = inlined_call_operand.vmem [shape: f32[32,128], index: 6, kind: input, shape index: {}]   ;;  %s633_s7 = inlined_call_operand.vmem [shape: f32[1,128], index: 7, kind: output, shape index: {}]  }
   0x1   :  { %v478_v0 = vld [vmem:[%s626_s4] sm:$0xff]   ;;  %v479_v1 = vld [vmem:[%s626_s4 + $0x8] sm:$0xff]   ;;  %v480_v2 = vld [vmem:[%s626_s4 + $0x10] sm:$0xff]   ;;  %31 = vst [vmem:[#allocation2] sm:$0xff] %v504_v38 }
   0x2   :  { %431 = vmatprep.subr.bf16.mxu0 %v478_v0  ;;  %v481_v3 = vld [vmem:[%s626_s4 + $0x18] sm:$0xff]   ;;  %v486_v4 = vld [vmem:[%s627_s3] sm:$0xff]   ;;  %v489_v6 = vld [vmem:[%s628_s5 + $0x8] sm:$0xff]  }
   0x3   :  { %432 = vmatpush3.bf16.msra.mxu0 %v478_v0  ;;  %447 = vmatprep.mubr.bf16.mxu0 %v486_v4  ;;  %v488_v5 = vld [vmem:[%s628_s5] sm:$0xff]   ;;  %v490_v8 = vld [vmem:[%s628_s5 + $0x10] sm:$0xff]   ;;  %v483_v9 = vld [vmem:[%s626_s4 + $0x28] sm:$0xff]  }
   0x4   :  { %433 = vmatprep.subr.bf16.mxu0 %v479_v1  ;;  %v482_v7 = vld [vmem:[%s626_s4 + $0x20] sm:$0xff]   ;;  %451 = vmatprep.subr.bf16.mxu1 %v488_v5  ;;  %v491_v10 = vld [vmem:[%s628_s5 + $0x18] sm:$0xff]   ;;  %v484_v11 = vld [vmem:[%s626_s4 + $0x30] sm:$0xff]  }
   0x5   :  { %452 = vmatpush3.bf16.msra.mxu1 %v488_v5  ;;  %v492_v12 = vld [vmem:[%s628_s5 + $0x20] sm:$0xff]   ;;  %v485_v13 = vld [vmem:[%s626_s4 + $0x38] sm:$0xff]   ;;  %v493_v14 = vld [vmem:[%s628_s5 + $0x28] sm:$0xff]  }
   0x6   :  { %453 = vmatprep.subr.bf16.mxu1 %v489_v6  ;;  %v487_v15 = vld [vmem:[%s627_s3 + $0x8] sm:$0xff]   ;;  %v494_v16 = vld [vmem:[%s628_s5 + $0x30] sm:$0xff]   ;;  %v495_v17 = vld [vmem:[%s628_s5 + $0x38] sm:$0xff]  }
   0x7   :  { %434 = vmatpush3.bf16.msra.mxu0 %v479_v1  ;;  %v324_v28 = vld [vmem:[%s629_s0] sm:$0xf] }
   0x8   :  { %435 = vmatprep.subr.bf16.mxu0 %v480_v2  ;;  %v326_v29 = vld [vmem:[%s630_s1] sm:$0xf]  ;;  %v325_v30 = vunpack.c.l.bf16 %v324_v28 }
   0x9   :  { %454 = vmatpush3.bf16.msra.mxu1 %v489_v6  ;;  %v327_v31 = vunpack.c.l.bf16 %v326_v29  ;;  %v32_v35 = vld [vmem:[%s631_s2] sm:$0xf] }
   0xa   :  { %455 = vmatprep.subr.bf16.mxu1 %v490_v8  ;;  %v33_v36 = vunpack.c.l.bf16 %v32_v35  ;;  %v328_v47 = vld [vmem:[#allocation2] sm:$0x1] }
   0xb   :  { %436 = vmatpush3.bf16.msra.mxu0 %v480_v2  ;;  %v329_v32 = vsub.f32 %v325_v30, %v327_v31  ;;  %v302_v2 = vld [vmem:[%s632_s6] sm:$0xff] }
   0xc   :  { %437 = vmatprep.subr.bf16.mxu0 %v481_v3  ;;  %v34_v39 = vmul.f32 %v33_v36, %v33_v36 }
   0xd   :  { %456 = vmatpush3.bf16.msra.mxu1 %v490_v8  ;;  %v330_v33 = vand.u32 2147483647, %v329_v32  ;;  %v303_v8 = vld [vmem:[%s632_s6 + $0x8] sm:$0xff] }
   0xe   :  { %457 = vmatprep.subr.bf16.mxu1 %v491_v10  ;;  %v35_v41 = vrot.slane %v34_v39, 4 }
   0xf   :  { %438 = vmatpush3.bf16.msra.mxu0 %v481_v3  ;;  %v331_v34 = vrot.slane %v330_v33, 4 }
  0x10   :  { %439 = vmatprep.subr.bf16.mxu0 %v482_v7  ;;  %v36_v43 = vadd.f32 %v35_v41, %v34_v39 }
  0x11   :  { %458 = vmatpush3.bf16.msra.mxu1 %v491_v10  ;;  %v332_v37 = vadd.f32 %v331_v34, %v330_v33 }
  0x12   :  { %459 = vmatprep.subr.bf16.mxu1 %v492_v12  ;;  %v37_v45 = vrot.slane %v36_v43, 2 }
  0x13   :  { %440 = vmatpush3.bf16.msra.mxu0 %v482_v7  ;;  %v333_v40 = vrot.slane %v332_v37, 2  ;;  %v304_v7 = vld [vmem:[%s632_s6 + $0x10] sm:$0xff] }
  0x14   :  { %441 = vmatprep.subr.bf16.mxu0 %v483_v9  ;;  %v38_v48 = vadd.f32 %v37_v45, %v36_v43 }
  0x15   :  { %460 = vmatpush3.bf16.msra.mxu1 %v492_v12  ;;  %v334_v42 = vadd.f32 %v333_v40, %v332_v37  ;;  %v305_v12 = vld [vmem:[%s632_s6 + $0x18] sm:$0xff] }
  0x16   :  { %461 = vmatprep.subr.bf16.mxu1 %v493_v14  ;;  %v39_v50 = vrot.slane %v38_v48, 1 }
  0x17   :  { %442 = vmatpush3.bf16.msra.mxu0 %v483_v9  ;;  %v335_v44 = vrot.slane %v334_v42, 1 }
  0x18   :  { %443 = vmatprep.subr.bf16.mxu0 %v484_v11  ;;  %v40_v51 = vadd.f32 %v39_v50, %v38_v48 }
  0x19   :  { %462 = vmatpush3.bf16.msra.mxu1 %v493_v14  ;;  %v336_v46 = vadd.f32 %v335_v44, %v334_v42 }
  0x1a   :  { %463 = vmatprep.subr.bf16.mxu1 %v494_v16  ;;  %41 = vst [vmem:[#allocation2 + $0x1] sm:$0x1] %v40_v51 }
  0x1b   :  { %444 = vmatpush3.bf16.msra.mxu0 %v484_v11  ;;  %v337_v49 = vadd.f32 %v336_v46, %v328_v47 }
  0x1c   :  { %445 = vmatprep.subr.bf16.mxu0 %v485_v13 }
  0x1d   :  { %464 = vmatpush3.bf16.msra.mxu1 %v494_v16  ;;  %338 = vst [vmem:[#allocation2] sm:$0x1] %v337_v49 }
  0x1e   :  { %465 = vmatprep.subr.bf16.mxu1 %v495_v17 }
  0x1f   :  { %446 = vmatpush3.bf16.msra.mxu0 %v485_v13 }
  0x21   :  { %466 = vmatpush3.bf16.msra.mxu1 %v495_v17  ;;  %v354_v54 = vld [vmem:[#allocation2 + $0x1] sm:$0x1] }
  0x22   :  { %448 = vmatmul.mubr.bf16.vlgmr.msra.gmra.mrb[0].mxu0 %v487_v15  ;;  %v355_v55 = vsel %vm343_vm0, %v354_v54, 0.0 }
  0x24   :  { %v342_v52 = vld [vmem:[#allocation2] sm:$0x1] }
  0x25   :  { %v344_v53 = vsel %vm343_vm0, %v342_v52, 0.0  ;;  %v377_v52 = vlaneseq }
  0x26   :  { %345 = vadd.xlane.f32.xlu0 %v344_v53 }
  0x27   :  { %v378_v53 = vand.u32 127, %v377_v52 }
  0x29   :  { %vm379_vm1 = vcmp.eq.s32.totalorder %v378_v53, 0  ;;  %vm382_vm2 = vcmp.eq.s32.totalorder %v378_v53, 1  ;;  %vm385_vm3 = vcmp.eq.s32.totalorder %v378_v53, 2 }
  0x2a   :  { %356 = vadd.xlane.f32.xlu0 %v355_v55 }
  0xb3   :  { %v346_v31 = vpop.xlane.xlu0 %345 }
  0xb4   :  { %v347_v32 = vrot.slane %v346_v31, 4 }
  0xb6   :  { %v348_v33 = vadd.f32 %v347_v32, %v346_v31 }
  0xb7   :  { %v357_v34 = vpop.xlane.xlu0 %356 }
  0xb8   :  { %v358_v35 = vrot.slane %v357_v34, 4  ;;  %v349_v36 = vrot.slane %v348_v33, 2 }
  0xba   :  { %v359_v37 = vadd.f32 %v358_v35, %v357_v34  ;;  %v350_v39 = vadd.f32 %v349_v36, %v348_v33 }
  0xbc   :  { %v360_v38 = vrot.slane %v359_v37, 2  ;;  %v351_v41 = vrot.slane %v350_v39, 1 }
  0xbe   :  { %v361_v40 = vadd.f32 %v360_v38, %v359_v37  ;;  %v352_v43 = vadd.f32 %v351_v41, %v350_v39 }
  0xc0   :  { %v362_v42 = vrot.slane %v361_v40, 1  ;;  %471 = vpush %v352_v43 }
  0xc2   :  { %v363_v44 = vadd.f32 %v362_v42, %v361_v40 }
  0xc4   :  { %473 = vpush %v363_v44 }
  0xf1   :  { %s472_s6 = spop %471 }
  0xf2   :  { %v380_v54 = vstv %s472_s6 }
  0xf3   :  { %v381_v55 = vsel %vm379_vm1, %v380_v54, 0.0 }
  0xf5   :  { %v449_v18 = vpop.f32.mrb[0].mxu0  ;;  %s474_s22 = spop %473 }
  0xf6   :  { %v156_v19 = vpop.f32.mrb[1].mxu0  ;;  %v173_v21 = vmul.f32 %v449_v18, %v449_v18 }
  0xf7   :  { %v450_v20 = vpop.f32.mrb[2].mxu0  ;;  %v171_v24 = vmul.f32 %v156_v19, %v156_v19 }
  0xf8   :  { %v174_v22 = vmul.f32 %v450_v20, %v450_v20  ;;  %v159_v23 = vpop.f32.mrb[3].mxu0 }
  0xf9   :  { %v172_v25 = vmul.f32 %v159_v23, %v159_v23 }
  0xfa   :  { %v176_v26 = vpack.c.bf16 %v174_v22, %v173_v21 }
  0xfb   :  { %v175_v27 = vpack.c.bf16 %v172_v25, %v171_v24 }
  0xfd   :  { %467 = vmatprep.mubr.bf16.mxu1 %v175_v27 }
  0xfe   :  { %468 = vmatmul.mubr.bf16.vlgmr.msra.gmra.mrb[0].mxu1 %v176_v26 }
 0x1d1   :  { %v469_v56 = vpop.f32.mrb[0].mxu1 }
 0x1d2   :  { %v292_v57 = vmax.f32 %v469_v56, 1e-05  ;;  %v275_v58 = vpop.f32.mrb[1].mxu1  ;;  %v383_v56 = vstv %s474_s22 }
 0x1d3   :  { %v290_v59 = vmax.f32 %v275_v58, 1e-05  ;;  %v470_v60 = vpop.f32.mrb[2].mxu1 }
 0x1d4   :  { %496 = vlog2.f32 %v292_v57  ;;  %v293_v61 = vmax.f32 %v470_v60, 1e-05  ;;  %v278_v62 = vpop.f32.mrb[3].mxu1  ;;  %v384_v57 = vsel %vm382_vm2, %v383_v56, %v381_v55 }
 0x1d5   :  { %498 = vlog2.f32 %v290_v59  ;;  %v291_v63 = vmax.f32 %v278_v62, 1e-05 }
 0x1d6   :  { %500 = vlog2.f32 %v293_v61 }
 0x1d7   :  { %502 = vlog2.f32 %v291_v63 }
 0x1de   :  { %v497_v0 = vpop.eup %496 }
 0x1df   :  { %v499_v1 = vpop.eup %498  ;;  %v299_v4 = vmul.f32 0.6931472, %v497_v0 }
 0x1e0   :  { %v501_v3 = vpop.eup %500  ;;  %v295_v5 = vmul.f32 0.6931472, %v499_v1 }
 0x1e1   :  { %v503_v6 = vpop.eup %502  ;;  %v301_v10 = vmul.f32 0.6931472, %v501_v3  ;;  %v308_v13 = vsub.f32 %v299_v4, %v304_v7 }
 0x1e2   :  { %v306_v9 = vsub.f32 %v295_v5, %v302_v2  ;;  %v297_v11 = vmul.f32 0.6931472, %v503_v6 }
 0x1e3   :  { %v309_v16 = vsub.f32 %v301_v10, %v305_v12  ;;  %v312_v18 = vand.u32 2147483647, %v308_v13 }
 0x1e4   :  { %v307_v14 = vsub.f32 %v297_v11, %v303_v8  ;;  %v310_v15 = vand.u32 2147483647, %v306_v9 }
 0x1e5   :  { %v313_v20 = vand.u32 2147483647, %v309_v16 }
 0x1e6   :  { %v311_v17 = vand.u32 2147483647, %v307_v14 }
 0x1e8   :  { %v314_v19 = vadd.f32 %v311_v17, %v310_v15 }
 0x1ea   :  { %v315_v21 = vadd.f32 %v314_v19, %v312_v18 }
 0x1ec   :  { %v316_v22 = vadd.f32 %v315_v21, %v313_v20 }
 0x1ee   :  { %v317_v23 = vrot.slane %v316_v22, 4 }
 0x1f0   :  { %v318_v24 = vadd.f32 %v317_v23, %v316_v22 }
 0x1f2   :  { %v319_v25 = vrot.slane %v318_v24, 2 }
 0x1f4   :  { %v320_v26 = vadd.f32 %v319_v25, %v318_v24 }
 0x1f6   :  { %v321_v27 = vrot.slane %v320_v26, 1 }
 0x1f8   :  { %v322_v28 = vadd.f32 %v321_v27, %v320_v26 }
 0x1fa   :  { %323 = vst [vmem:[#allocation2 + $0x2] sm:$0x1] %v322_v28 }
 0x201   :  { %v365_v29 = vld [vmem:[#allocation2 + $0x2] sm:$0x1] }
 0x202   :  { %v366_v30 = vsel %vm343_vm0, %v365_v29, 0.0 }
 0x203   :  { %367 = vadd.xlane.f32.xlu1 %v366_v30 }
 0x290   :  { %v368_v45 = vpop.xlane.xlu1 %367 }
 0x291   :  { %v369_v46 = vrot.slane %v368_v45, 4 }
 0x293   :  { %v370_v47 = vadd.f32 %v369_v46, %v368_v45 }
 0x295   :  { %v371_v48 = vrot.slane %v370_v47, 2 }
 0x297   :  { %v372_v49 = vadd.f32 %v371_v48, %v370_v47 }
 0x299   :  { %v373_v50 = vrot.slane %v372_v49, 1 }
 0x29b   :  { %v374_v51 = vadd.f32 %v373_v50, %v372_v49 }
 0x29d   :  { %475 = vpush %v374_v51 }
 0x2ce   :  { %s476_s23 = spop %475 }
 0x2cf   :  { %s376_s24 = smul.f32 0.0024038462, %s476_s23 }
 0x2d1   :  { %v386_v58 = vstv %s376_s24 }
 0x2d2   :  { %v387_v59 = vsel %vm385_vm3, %v386_v58, %v384_v57 }
 0x2d3   :  { %388 = vst [vmem:[%s633_s7] sm:$0x1] %v387_v59 }

</bundles_post_ra>
